<compile_context>
chip_gen: v5e
topology: v5e:2x2
jax: 0.10.0
libtpu: 0.0.40
codegen_flags: <defaults>
</compile_context>

<pallas_src>
import jax
import jax.numpy as jnp
from jax.experimental import pallas as pl
from jax.experimental.pallas import tpu as pltpu


def mux_kernel(x_ref, w_ref, b_ref, out_ref):
    """One (batch-element, spatial-tile) step.

    x_ref   : (1, C_in, TM)          VMEM tile, spatial on the lane axis
    w_ref   : (C_out, C_in)  f32     constant VMEM block (1x1 conv weight)
    b_ref   : (C_out, 1)     f32     constant VMEM block (bias)
    out_ref : (1, C_out + C_in, TM)  [conv1x1(x), x] stacked on channels
    """
    x = x_ref[0]                                   # (C_in, TM), native dtype
    c_out, c_in = w_ref.shape

    xf = x.astype(jnp.float32)

    # y = W @ x + b as column-broadcast VPU FMAs, accumulated directly into a
    # single (C_out, TM) f32 value -- no per-row slices, no concatenates.
    acc = w_ref[:, 0:1] * xf[0:1, :]               # (C_out,1)*(1,TM) -> (C_out,TM)
    for k in range(1, c_in):                       # static, fully unrolled
        acc = acc + w_ref[:, k:k + 1] * xf[k:k + 1, :]
    acc = acc + b_ref[...]                         # (C_out,1) broadcast over lanes

    # Two half-height sub-stores: conv result in the first C_out channel rows,
    # the passthrough input in the remaining C_in rows.
    out_ref[0, :c_out, :] = acc.astype(out_ref.dtype)
    out_ref[0, c_out:, :] = x


def _choose_tile_hw(HW, N, max_tile_hw, min_grid_steps):
    """Pick the spatial (lane) tile width.

    * Whole H*W slab per batch element when it fits under max_tile_hw (one
      fully contiguous DMA per step, maximal amortization of per-step cost).
    * Otherwise the largest 128-multiple <= max_tile_hw; the last block may be
      ragged (OOB reads padded, OOB writes masked -- fine for elementwise ops),
      so no wrapper-side pad/slice pass over HBM is needed.
    * If that leaves fewer than min_grid_steps steps (v7x: 2 TensorCores share
      HBM), shrink the tile -- still 128-aligned -- so both cores get work.
    """
    max_tile_hw = max(128, (max_tile_hw // 128) * 128)
    tile_hw = HW if HW <= max_tile_hw else max_tile_hw

    steps = N * pl.cdiv(HW, tile_hw)
    if steps < min_grid_steps and HW > 128:
        tiles_per_batch = pl.cdiv(min_grid_steps, N)
        cand = pl.cdiv(pl.cdiv(HW, tiles_per_batch), 128) * 128
        tile_hw = min(tile_hw, max(cand, 128))
    return tile_hw


def mux_forward(x_nchw, weight, bias, *, max_tile_hw=65536, min_grid_steps=4):
    """x_nchw: (N, C_in, H, W); weight: (C_out, C_in, 1, 1); bias: (C_out,)."""
    N, C_in, H, W = x_nchw.shape
    C_out = weight.shape[0]
    HW = H * W

    # Pure reshapes (no transposes): spatial stays on the fast/lane axis.
    x3d = x_nchw.reshape(N, C_in, HW)
    # Constants as tiny VMEM blocks with a constant index_map (fetched once,
    # never re-DMA'd); f32 so the compute path is f32 regardless of input dtype.
    w2d = weight.reshape(C_out, C_in).astype(jnp.float32)
    b2d = bias.reshape(C_out, 1).astype(jnp.float32)

    tile_hw = _choose_tile_hw(HW, N, max_tile_hw, min_grid_steps)
    grid = (N, pl.cdiv(HW, tile_hw))               # ragged last tile is OK

    out3d = pl.pallas_call(
        mux_kernel,
        out_shape=jax.ShapeDtypeStruct((N, C_out + C_in, HW), x_nchw.dtype),
        grid_spec=pltpu.PrefetchScalarGridSpec(
            num_scalar_prefetch=0,
            grid=grid,
            in_specs=[
                pl.BlockSpec((1, C_in, tile_hw), lambda n, j: (n, 0, j)),
                pl.BlockSpec((C_out, C_in), lambda n, j: (0, 0)),
                pl.BlockSpec((C_out, 1), lambda n, j: (0, 0)),
            ],
            out_specs=pl.BlockSpec((1, C_out + C_in, tile_hw),
                                   lambda n, j: (n, 0, j)),
        ),
        compiler_params=pltpu.CompilerParams(
            dimension_semantics=("parallel", "parallel"),
            # Explicit scoped-VMEM budget: portable across v5e (16 MiB default),
            # v6e (32 MiB) and v7x (32 MiB default / 64 MiB physical).  The
            # 64K-lane f32 double-buffered working set is ~6 MiB.
            vmem_limit_bytes=32 * 1024 * 1024,
        ),
    )(x3d, w2d, b2d)

    return out3d.reshape(N, C_out + C_in, H, W)


def mux_reference(x_nchw, weight, bias):
    """Pure-JAX reference of torch.cat([conv1x1(x), x], dim=1)."""
    y = jax.lax.conv_general_dilated(
        x_nchw.astype(jnp.float32), weight.astype(jnp.float32),
        window_strides=(1, 1), padding="VALID",
        dimension_numbers=("NCHW", "OIHW", "NCHW"))
    y = y + bias.reshape(1, -1, 1, 1)
    return jnp.concatenate([y.astype(x_nchw.dtype), x_nchw], axis=1)


if __name__ == "__main__":
    key = jax.random.PRNGKey(0)
    kx, kw, kb = jax.random.split(key, 3)

    N, C_in, H, W = 2, 4, 16, 16   # per-batch spatial slab = 256 lanes
    C_out = 4

    x = jax.random.normal(kx, (N, C_in, H, W), dtype=jnp.float32)
    weight = jax.random.normal(kw, (C_out, C_in, 1, 1), dtype=jnp.float32) * 0.1
    bias = jax.random.normal(kb, (C_out,), dtype=jnp.float32) * 0.1

    out = jax.block_until_ready(mux_forward(x, weight, bias))

    ref = mux_reference(x, weight, bias)
    assert out.shape == (N, C_out + C_in, H, W), out.shape
    assert jnp.allclose(out, ref, atol=1e-5, rtol=1e-5), "mismatch vs reference"

    print("KERNEL_OK")
</pallas_src>

<mosaic_0001>
module attributes {stable_mosaic.version = 11 : i64} {
  func.func @mux_kernel(%arg0: i32, %arg1: i32, %arg2: memref<1x4x128xf32, #tpu.memory_space<vmem>>, %arg3: memref<4x4xf32, #tpu.memory_space<vmem>>, %arg4: memref<4x1xf32, #tpu.memory_space<vmem>>, %arg5: memref<1x8x128xf32, #tpu.memory_space<vmem>>) attributes {dimension_semantics = [#tpu.dimension_semantics<parallel>, #tpu.dimension_semantics<parallel>], iteration_bounds = array<i64: 2, 2>, scalar_prefetch = 0 : i64, scratch_operands = 0 : i64, tpu.core_type = #tpu.core_type<tc>, window_params = [{transform_indices = @transform_0, window_bounds = array<i64: 1, 4, 128>}, {pipeline_mode = #tpu.pipeline_mode<synchronous>, transform_indices = @transform_1, window_bounds = array<i64: 4, 4>}, {pipeline_mode = #tpu.pipeline_mode<synchronous>, transform_indices = @transform_2, window_bounds = array<i64: 4, 1>}, {transform_indices = @transform_3, window_bounds = array<i64: 1, 8, 128>}]} {
    %c0 = arith.constant 0 : index
    %c0_0 = arith.constant 0 : index
    %c0_1 = arith.constant 0 : index
    %0 = vector.load %arg2[%c0, %c0_0, %c0_1] : memref<1x4x128xf32, #tpu.memory_space<vmem>>, vector<1x4x128xf32>
    %1 = vector.shape_cast %0 : vector<1x4x128xf32> to vector<4x128xf32>
    %c0_2 = arith.constant 0 : index
    %c0_3 = arith.constant 0 : index
    %2 = vector.load %arg3[%c0_2, %c0_3] : memref<4x4xf32, #tpu.memory_space<vmem>>, vector<4x1xf32>
    %3 = vector.extract_strided_slice %1 {offsets = [0, 0], sizes = [1, 128], strides = [1, 1]} : vector<4x128xf32> to vector<1x128xf32>
    %4 = vector.broadcast %2 : vector<4x1xf32> to vector<4x128xf32>
    %5 = vector.broadcast %3 : vector<1x128xf32> to vector<4x128xf32>
    %6 = arith.mulf %4, %5 : vector<4x128xf32>
    %c0_4 = arith.constant 0 : index
    %c1 = arith.constant 1 : index
    %7 = vector.load %arg3[%c0_4, %c1] : memref<4x4xf32, #tpu.memory_space<vmem>>, vector<4x1xf32>
    %8 = vector.extract_strided_slice %1 {offsets = [1, 0], sizes = [1, 128], strides = [1, 1]} : vector<4x128xf32> to vector<1x128xf32>
    %9 = vector.broadcast %7 : vector<4x1xf32> to vector<4x128xf32>
    %10 = vector.broadcast %8 : vector<1x128xf32> to vector<4x128xf32>
    %11 = arith.mulf %9, %10 : vector<4x128xf32>
    %12 = arith.addf %6, %11 : vector<4x128xf32>
    %c0_5 = arith.constant 0 : index
    %c2 = arith.constant 2 : index
    %13 = vector.load %arg3[%c0_5, %c2] : memref<4x4xf32, #tpu.memory_space<vmem>>, vector<4x1xf32>
    %14 = vector.extract_strided_slice %1 {offsets = [2, 0], sizes = [1, 128], strides = [1, 1]} : vector<4x128xf32> to vector<1x128xf32>
    %15 = vector.broadcast %13 : vector<4x1xf32> to vector<4x128xf32>
    %16 = vector.broadcast %14 : vector<1x128xf32> to vector<4x128xf32>
    %17 = arith.mulf %15, %16 : vector<4x128xf32>
    %18 = arith.addf %12, %17 : vector<4x128xf32>
    %c0_6 = arith.constant 0 : index
    %c3 = arith.constant 3 : index
    %19 = vector.load %arg3[%c0_6, %c3] : memref<4x4xf32, #tpu.memory_space<vmem>>, vector<4x1xf32>
    %20 = vector.extract_strided_slice %1 {offsets = [3, 0], sizes = [1, 128], strides = [1, 1]} : vector<4x128xf32> to vector<1x128xf32>
    %21 = vector.broadcast %19 : vector<4x1xf32> to vector<4x128xf32>
    %22 = vector.broadcast %20 : vector<1x128xf32> to vector<4x128xf32>
    %23 = arith.mulf %21, %22 : vector<4x128xf32>
    %24 = arith.addf %18, %23 : vector<4x128xf32>
    %c0_7 = arith.constant 0 : index
    %c0_8 = arith.constant 0 : index
    %25 = vector.load %arg4[%c0_7, %c0_8] : memref<4x1xf32, #tpu.memory_space<vmem>>, vector<4x1xf32>
    %26 = vector.broadcast %25 : vector<4x1xf32> to vector<4x128xf32>
    %27 = arith.addf %24, %26 : vector<4x128xf32>
    %c0_9 = arith.constant 0 : index
    %c0_10 = arith.constant 0 : index
    %c0_11 = arith.constant 0 : index
    %28 = vector.load %arg5[%c0_9, %c0_10, %c0_11] : memref<1x8x128xf32, #tpu.memory_space<vmem>>, vector<1x4x128xf32>
    %29 = vector.shape_cast %28 : vector<1x4x128xf32> to vector<4x128xf32>
    %30 = vector.shape_cast %27 : vector<4x128xf32> to vector<1x4x128xf32>
    tpu.vector_store %arg5[%c0_9, %c0_10, %c0_11], %30 {strides = array<i32>} : memref<1x8x128xf32, #tpu.memory_space<vmem>>, vector<1x4x128xf32>,
    %c0_12 = arith.constant 0 : index
    %c4 = arith.constant 4 : index
    %c0_13 = arith.constant 0 : index
    %31 = vector.load %arg5[%c0_12, %c4, %c0_13] : memref<1x8x128xf32, #tpu.memory_space<vmem>>, vector<1x4x128xf32>
    %32 = vector.shape_cast %31 : vector<1x4x128xf32> to vector<4x128xf32>
    %33 = vector.shape_cast %1 : vector<4x128xf32> to vector<1x4x128xf32>
    tpu.vector_store %arg5[%c0_12, %c4, %c0_13], %33 {strides = array<i32>} : memref<1x8x128xf32, #tpu.memory_space<vmem>>, vector<1x4x128xf32>,
    return
  }
  func.func @transform_0(%arg0: i32, %arg1: i32) -> (i32, i32, i32) {
    %c0_i32 = arith.constant 0 : i32
    %c0_i32_0 = arith.constant 0 : i32
    return %arg0, %c0_i32, %arg1 : i32, i32, i32
  }
  func.func @transform_1(%arg0: i32, %arg1: i32) -> (i32, i32) {
    %c0_i32 = arith.constant 0 : i32
    %c0_i32_0 = arith.constant 0 : i32
    %c0_i32_1 = arith.constant 0 : i32
    return %c0_i32, %c0_i32_0 : i32, i32
  }
  func.func @transform_2(%arg0: i32, %arg1: i32) -> (i32, i32) {
    %c0_i32 = arith.constant 0 : i32
    %c0_i32_0 = arith.constant 0 : i32
    %c0_i32_1 = arith.constant 0 : i32
    return %c0_i32, %c0_i32_0 : i32, i32
  }
  func.func @transform_3(%arg0: i32, %arg1: i32) -> (i32, i32, i32) {
    %c0_i32 = arith.constant 0 : i32
    %c0_i32_0 = arith.constant 0 : i32
    return %arg0, %c0_i32, %arg1 : i32, i32, i32
  }
}

</mosaic_0001>

<bundles_post_ra>
// kernel: tpu_custom_call.1
= control target key start
LH: loop header
LB: loop body
LE: loop exit
PB: predicated region body
PF: predicated region fallthrough
CT: control target
= control target key end

     0   :  { %8 = vsyncpa [#allocation3], 0  ;;  %s754_s0 = inlined_call_operand.hbm [shape: f32[2,4,256], index: 0, kind: input, shape index: {}]   ;;  %s755_s1 = inlined_call_operand.vmem [shape: f32[4,4], index: 1, kind: input, shape index: {}]   ;;  %s756_s2 = inlined_call_operand.vmem [shape: f32[4,1], index: 2, kind: input, shape index: {}]   ;;  %s757_s3 = inlined_call_operand.hbm [shape: f32[2,8,256], index: 3, kind: output, shape index: {}]  }
   0x1   :  { %10 = vsyncpa [#allocation3 + $0x1], 0 }
   0x2   :  { %11 = vsyncpa [#allocation4], 0 }
   0x3   :  { %13 = vsyncpa [#allocation4 + $0x1], 0  ;;  %s605_s12 = smov 0   ;;  %s607_s13 = smov 0  }
   0x4   :  { %s609_s14 = smov 0   ;;  %s611_s15 = smov 0  }
   0x5   :  { %s613_s16 = smov 0   ;;  %s615_s17 = smov 0  }
   0x6   :  { %s617_s18 = smov 0   ;;  %s619_s19 = smov 0  }
   0x7 LB: > { %s348_s20 = sadd.s32 4294967295, %s579_s19   ;;  %s349_s21 = sadd.s32 4294967294, %s579_s19   ;;  %s579_s19 = sphi %s619_s19, %s19_s19   ;;  %s575_s18 = sphi %s617_s18, %s771_s18   ;;  %s571_s17 = sphi %s615_s17, %s770_s17   ;;  %s567_s16 = sphi %s613_s16, %s769_s16   ;;  %s563_s15 = sphi %s611_s15, %s768_s15   ;;  %s559_s14 = sphi %s609_s14, %s767_s14   ;;  %s555_s13 = sphi %s607_s13, %s766_s13   ;;  %s551_s12 = sphi %s605_s12, %s765_s12  }
   0x8   : > { %s28_s22 = sadd.s32 1, %s571_s17  ;;  %s31_s23 = sadd.s32 1, %s575_s18 }
   0x9   : > { %p29_p0 = scmp.ge.s32.totalorder %s28_s22, 2  ;;  %s40_s24 = sadd.s32 1, %s559_s14 }
   0xa   : > { %p47_p1 = scmp.ne.s32.totalorder %s559_s14, %s555_s13  ;;  %p48_p2 = scmp.eq.s32.totalorder %s579_s19, 0 }
   0xb   : > { %s773_s22 = smov (%p29_p0, %s28_s22), 0  ;;  %s775_s23 = smov (!%p29_p0, %s31_s23), %s575_s18 }
   0xc   : > { %s36_s25 = ssub.s32 %s571_s17, %s773_s22  ;;  %p658_p3 = por %p48_p2, %p47_p1 }
   0xd   : > { %p33_p4 = scmp.ge.s32.totalorder %s775_s23, 2  ;;  %p53_p5 = scmp.ne.s32.totalorder %s555_s13, %s551_s12 }
   0xe   : > { %p54_p6 = scmp.eq.s32.totalorder %s348_s20, 0  ;;  %p121_p7 = scmp.eq.s32.totalorder %s348_s20, 3 }
   0xf   : > { %s777_s23 = smov (%p33_p4, %s775_s23), 0  ;;  %p127_p10 = scmp.eq.s32.totalorder %s349_s21, 3 }
  0x10   : > { %760 = sst [smem:[#allocation8_spill]] %s777_s23  ;;  %p666_p8 = por %p54_p6, %p53_p5 }
  0x11   : > { %p670_p9 = por %p121_p7, %p47_p1  ;;  %s35_s29 = ssub.s32 %s575_s18, %s777_s23 }
  0x12   : > { %s37_s30 = sor.u32 %s36_s25, %s35_s29  ;;  %p676_p12 = por %p127_p10, %p53_p5 }
  0x13   : > { %p38_p11 = scmp.eq.s32.totalorder %s37_s30, 0  ;;  %p375_p13 = scmp.lt.s32.totalorder %s579_s19, 4 }
  0x14   : > { %s153_s5 = sand.u32 1, %s559_s14   ;;  %s353_s8 = sshll.u32 %s575_s18, 1 }
  0x15   : > { %s683_s6 = scalar_select %p38_p11, %s559_s14, %s40_s24  }
  0x16   : > { %s352_s7 = sshll.u32 %s153_s5, 2  ;;  %s161_s9 = sadd.s32 %s571_s17, %s353_s8 }
  0x17   : > { %s157_s10 = scalar_lea.vmem [#allocation2], %s352_s7  ;;  %s354_s20 = sshll.u32 %s161_s9, 2 }
  0x18   : > { %s167_s11 = sshll.u32 %s157_s10, 4  ;;  %s163_s29 = scalar_lea.hbm %s754_s0, %s354_s20  ;;  %s168_s11 = int_to_ptr.vmem [resolvable:$true] %s167_s11 }
  0x19   : > { %p368_p0 = pnand %p375_p13, %p658_p3  ;;  %s165_s30 = sshll.u32 %s163_s29, 4  ;;  %s166_s30 = int_to_ptr.hbm [resolvable:$true] %s165_s30 }
  0x1a   : > { %p355_p1 = scmp.ge.s32.totalorder %s579_s19, 1  ;;  %s154_s23 = scalar_lea.sflag [#allocation3], %s153_s5 }
  0x1b   : > { %370 = dma.hbm_to_vmem [thread:$0]  (!%p368_p0), %s166_s30, 64, %s168_s11, %s154_s23  }
  0x1c   : > { %p172_p2 = scmp.lt.s32.totalorder %s579_s19, 5 }
  0x1e   : > { %p173_p4 = pnand %p355_p1, %p172_p2 }
  0x1f   : > { %s695_s24 = sand.u32 (!%p173_p4), 1, %s555_s13  }
  0x20   : > { %176 = sbr.rel (%p173_p4) target bundleno = 177 (0xb1), region = 32  ;;  %s356_s7 = sshll.u32 (!%p173_p4), %s695_s24, 2 }
  0x21   : > { %s179_s8 = scalar_lea.sflag (!%p173_p4), [#allocation3], %s695_s24  ;;  %s182_s9 = scalar_lea.vmem (!%p173_p4), [#allocation2], %s356_s7 }
  0x25   : > { %542 = dma.done.wait (%p666_p8), %s179_s8, 64  }
  0x26   : > { %544 = vsyncadd (%p666_p8), %s179_s8, 4294967232  ;;  %v581_v0 = vmov 0   ;;  %v582_v1 = vmov 2   ;;  %v207_v2 = vld [vmem:[%s755_s1] sm:$0xf]  ;;  %v583_v4 = vmov 1  }
  0x27   : > { %445 = vset.pattern.permute.xlu0 %v581_v0  ;;  %447 = vset.pattern.permute.xlu1 %v582_v1  ;;  %v236_v3 = vld [vmem:[%s756_s2] sm:$0xf]  ;;  %v584_v5 = vmov 3   ;;  %s357_s27 = sshll.u32 %s695_s24, 3  ;;  %s359_s20 = sshll.u32 %s567_s16, 1 }
  0x28   : > { %449 = vset.pattern.permute.xlu2 %v581_v0  ;;  %210 = vperm.xlu0 %445, %v207_v2   ;;  %v206_v6 = vld [vmem:[%s182_s9] sm:$0xf]  ;;  %s205_s11 = scalar_lea.vmem [#allocation5], %s357_s27  ;;  %s256_s21 = sadd.s32 %s563_s15, %s359_s20 }
  0x29   : > { %223 = vperm.xlu1 %447, %v207_v2   ;;  %239 = vperm.xlu2 %449, %v236_v3   ;;  %244 = vst [vmem:[%s205_s11 + $0x4] sm:$0xf] %v206_v6  ;;  %v213_v9 = vperm.slane %v206_v6, 0  ;;  %v219_v10 = vperm.slane %v206_v6, 1  ;;  %v226_v11 = vperm.slane %v206_v6, 2  ;;  %v233_v12 = vperm.slane %v206_v6, 3 }
  0x2a   : > { %s360_s25 = sshll.u32 %s256_s21, 3  ;;  %s260_s16 = sshll.u32 %s205_s11, 4  ;;  %s261_s16 = int_to_ptr.vmem [resolvable:$true] %s260_s16 }
  0x2b   : > { %s258_s7 = scalar_lea.hbm %s757_s3, %s360_s25  ;;  %s246_s8 = scalar_lea.sflag [#allocation4], %s695_s24 }
  0x2c   : > { %s262_s15 = sshll.u32 %s258_s7, 4  ;;  %s501_s10 = scalar_lea.hbm %s757_s3, 32  ;;  %s263_s15 = int_to_ptr.hbm [resolvable:$true] %s262_s15 }
  0x2d   : > { %s495_s9 = sshra.s32 %s263_s15, 4  ;;  %s496_s9 = int_to_ptr.hbm [resolvable:$true] %s495_s9 }
  0x2e   : > { %s497_s23 = scalar_lea.hbm %s496_s9, 8  ;;  %p502_p7 = scmp.lt.s32.totalorder %s496_s9, %s757_s3 }
  0x2f   : > { %p498_p3 = scmp.ne.s32.totalorder %s496_s9, %s497_s23  ;;  %p503_p8 = scmp.lt.s32.totalorder %s501_s10, %s497_s23 }
  0x30   : > { %446 = vset.pattern.permute.xlu0 %v583_v4 }
  0x31   : > { %448 = vset.pattern.permute.xlu1 %v584_v5  ;;  %216 = vperm.xlu0 %446, %v207_v2   ;;  %p499_p5 = pnand %p498_p3, %p670_p9  ;;  %p504_p10 = por %p503_p8, %p502_p7 }
  0x32   : > { %230 = vperm.xlu1 %448, %v207_v2  }
  0x33   : > { %p500_p6 = pneg %p499_p5 }
  0x35   : > { %p505_p11 = pnand %p504_p10, %p500_p6 }
  0x39   : > { %450 = vset.pattern.permute.xlu0 %v581_v0 }
  0x83   : > { %v240_v21 = vpop.permute.xlu2 %239 }
  0x9a   : > { %v211_v7 = vpop.permute.xlu0 %210 }
  0x9b   : > { %v224_v8 = vpop.permute.xlu1 %223  ;;  %v214_v15 = vmul.f32 %v213_v9, %v211_v7 }
  0x9c   : > { %v227_v17 = vmul.f32 %v226_v11, %v224_v8 }
  0xa3   : > { %v217_v13 = vpop.permute.xlu0 %216 }
  0xa4   : > { %v231_v14 = vpop.permute.xlu1 %230  ;;  %v220_v16 = vmul.f32 %v219_v10, %v217_v13 }
  0xa5   : > { %v234_v19 = vmul.f32 %v233_v12, %v231_v14 }
  0xa6   : > { %v221_v18 = vadd.f32 %v220_v16, %v214_v15 }
  0xa8   : > { %v228_v20 = vadd.f32 %v227_v17, %v221_v18 }
  0xaa   : > { %v235_v22 = vadd.f32 %v234_v19, %v228_v20 }
  0xac   : > { %v242_v23 = vadd.f32 %v240_v21, %v235_v22 }
  0xae   : > { %243 = vst [vmem:[%s205_s11] sm:$0xf] %v242_v23 }
  0xaf   : > { %508 = shalt.err (!%p505_p11)
}
  0xb0   : > { %365 = dma.vmem_to_hbm [thread:$0]  (%p670_p9), %s261_s16, 128, %s263_s15, %s246_s8  }
  0xb1 PF: > { %p376_p13 = scmp.ge.s32.totalorder %s579_s19, 2  ;;  %s274_s24 = sand.u32 1, %s551_s12  }
  0xb2   : > { %s275_s11 = scalar_lea.sflag [#allocation4], %s274_s24 }
  0xb3   : > { %p372_p0 = pnand %p376_p13, %p676_p12 }
  0xb5   : > { %p373_p1 = pneg %p372_p0 }
  0xb7   : > { %546 = dma.done.wait (%p373_p1), %s275_s11, 128  }
  0xb8   : > { %548 = vsyncadd (%p373_p1), %s275_s11, 4294967168  ;;  %s19_s19 = sadd.s32 1, %s579_s19   ;;  %s764_s28 = sld [smem:[#allocation8_spill]] }
  0xb9   : > { %p16_p2 = scmp.ge.s32.totalorder %s19_s19, 6   ;;  %s765_s12 = smov %s555_s13 }
  0xba   : > { %s766_s13 = smov %s559_s14  ;;  %s767_s14 = smov %s683_s6 }
  0xbb   : > { %s768_s15 = smov %s571_s17  ;;  %s769_s16 = smov %s575_s18 }
  0xbc   : > { %s770_s17 = smov %s773_s22  ;;  %18 = sbr.rel (!%p16_p2) target bundleno = 7 (0x7), region = 77 }
  0xbe   : > { %s771_s18 = smov %s764_s28 }
  0xc1   :  { %281 = vsyncpa [#allocation3], 1 }
  0xc2   :  { %283 = vsyncpa [#allocation3 + $0x1], 1 }
  0xc3   :  { %284 = vsyncpa [#allocation4], 1 }
  0xc4   :  { %286 = vsyncpa [#allocation4 + $0x1], 1 }

</bundles_post_ra>
